<compile_context>
chip_gen: v6e
topology: v6e:2x2x1
jax: 0.10.0
libtpu: 0.0.40
codegen_flags: <defaults>
</compile_context>

<pallas_src>
import math
from functools import partial

import jax
import jax.numpy as jnp
from jax.experimental import pallas as pl
from jax.experimental.pallas import tpu as pltpu


def _round_up(x, m):
    return ((x + m - 1) // m) * m


def _ffactor_kernel(x_ref, w1_ref, b1_ref, w2_ref, b2_ref, o_ref):
    x = x_ref[...]

    # --- layer 0: Linear + ReLU (normalize=False) ---
    h1 = jnp.dot(x, w1_ref[...], preferred_element_type=jnp.float32) + b1_ref[...]
    h1 = jnp.maximum(h1, 0.0)

    # --- layer 1: L2 normalize (torch F.normalize, p=2, eps=1e-12) ---
    # rsqrt(max(sumsq, eps^2)) == 1 / max(||h1||, eps); rsqrt issues on the EUP
    # slot, keeping the vector divide off the VALU. Padded lanes of h1 are zero
    # so they do not perturb the norm.
    sumsq = jnp.sum(h1 * h1, axis=-1, keepdims=True)
    h1n = h1 * jax.lax.rsqrt(jnp.maximum(sumsq, 1e-24))

    # --- layer 1: Linear + ReLU ---
    h2 = jnp.dot(h1n, w2_ref[...], preferred_element_type=jnp.float32) + b2_ref[...]
    o_ref[...] = jnp.maximum(h2, 0.0)


def prepare_params(w1, b1, w2, b2):
    """Pad parameters once at init time (hoisted out of the per-step path).

    w1: [F, H], b1: [H], w2: [H, H], b2: [H]  ([in, out] layout).
    F is padded to a multiple of 8 (sublane dim of w1), H to a multiple of 128
    (lane dim everywhere). Zero padding is exact through the matmuls, the ReLUs
    and the L2 norm.
    """
    F, H = w1.shape
    Fp = _round_up(F, 8)
    Hp = _round_up(H, 128)

    w1p = jnp.pad(w1.astype(jnp.float32), ((0, Fp - F), (0, Hp - H)))
    b1p = jnp.pad(b1.astype(jnp.float32), (0, Hp - H)).reshape(1, Hp)
    w2p = jnp.pad(w2.astype(jnp.float32), ((0, Hp - H), (0, Hp - H)))
    b2p = jnp.pad(b2.astype(jnp.float32), (0, Hp - H)).reshape(1, Hp)
    return w1p, b1p, w2p, b2p


@partial(jax.jit, static_argnames=("block_b",))
def ffactor_forward_padded(x, w1p, b1p, w2p, b2p, *, block_b=128):
    """Forward pass on pre-padded params.

    x: [B, F] f32 (unpadded). Returns the H-padded output [Bp, Hp]; consumers
    read the first B rows / H lanes (keeps a lane-dense, 128-wide layout
    end-to-end and avoids an extra HBM-touching slice around a
    microsecond-scale kernel).
    """
    B, F = x.shape
    Fp, Hp = w1p.shape

    # Batch tile: multiple of 8 sublanes, capped at block_b (block_b=128 keeps
    # the per-iteration VMEM footprint tiny -> safe even on v7x's 64 MiB VMEM,
    # and gives the grid enough steps to double-buffer / megacore-shard for
    # larger batches).
    Bp = _round_up(B, 8)
    TB = min(block_b, Bp)
    Bp = _round_up(Bp, TB)

    # Single pad on the activation; skipped entirely when already aligned.
    x = x.astype(jnp.float32)
    if Bp != B or Fp != F:
        xp = jnp.pad(x, ((0, Bp - B), (0, Fp - F)))
    else:
        xp = x

    grid = (Bp // TB,)

    cost = pl.CostEstimate(
        flops=2 * Bp * (Fp * Hp + Hp * Hp),
        transcendentals=Bp,  # one rsqrt per row
        bytes_accessed=4 * (Bp * Fp + Fp * Hp + Hp + Hp * Hp + Hp + Bp * Hp),
    )

    return pl.pallas_call(
        _ffactor_kernel,
        out_shape=jax.ShapeDtypeStruct((Bp, Hp), jnp.float32),
        grid=grid,
        in_specs=[
            pl.BlockSpec((TB, Fp), lambda i: (i, 0)),   # batch-tiled activations
            pl.BlockSpec((Fp, Hp), lambda i: (0, 0)),   # weights stay VMEM-resident
            pl.BlockSpec((1, Hp), lambda i: (0, 0)),
            pl.BlockSpec((Hp, Hp), lambda i: (0, 0)),
            pl.BlockSpec((1, Hp), lambda i: (0, 0)),
        ],
        out_specs=pl.BlockSpec((TB, Hp), lambda i: (i, 0)),
        compiler_params=pltpu.CompilerParams(
            dimension_semantics=("parallel",),  # shard batch tiles across TCs (v7x)
        ),
        cost_estimate=cost,
    )(xp, w1p, b1p, w2p, b2p)


def ffactor_forward(x, w1, b1, w2, b2):
    """Convenience wrapper matching the PyTorch module exactly: returns [B, H]."""
    H = w1.shape[1]
    w1p, b1p, w2p, b2p = prepare_params(w1, b1, w2, b2)
    out = ffactor_forward_padded(x, w1p, b1p, w2p, b2p)
    return out[: x.shape[0], :H]


# ----------------------------- reference / test -----------------------------


def _kaiming_uniform(key, fan_in, fan_out):
    # torch.nn.init.kaiming_uniform_(mode='fan_in', nonlinearity='relu'):
    # bound = gain * sqrt(3 / fan_in), gain = sqrt(2)
    bound = math.sqrt(2.0) * math.sqrt(3.0 / fan_in)
    # Stored as [in, out] (transposed relative to torch's [out, in]).
    return jax.random.uniform(key, (fan_in, fan_out), jnp.float32, -bound, bound)


def _linear_bias(key, fan_in, fan_out):
    # torch.nn.Linear default bias init: U(-1/sqrt(fan_in), 1/sqrt(fan_in))
    bound = 1.0 / math.sqrt(fan_in)
    return jax.random.uniform(key, (fan_out,), jnp.float32, -bound, bound)


def _reference_forward(x, w1, b1, w2, b2):
    h1 = jnp.maximum(x @ w1 + b1, 0.0)
    norm = jnp.sqrt(jnp.sum(h1 * h1, axis=-1, keepdims=True))
    h1n = h1 / jnp.maximum(norm, 1e-12)
    return jnp.maximum(h1n @ w2 + b2, 0.0)


if __name__ == "__main__":
    # CartPole-ish sizes: state_space=4, action_space=2 -> in_features=6, hidden=64
    state_space, action_space, hidden = 4, 2, 64
    in_features = state_space + action_space

    key = jax.random.PRNGKey(0)
    kx, kw1, kb1, kw2, kb2, kx2 = jax.random.split(key, 6)

    w1 = _kaiming_uniform(kw1, in_features, hidden)
    b1 = _linear_bias(kb1, in_features, hidden)
    w2 = _kaiming_uniform(kw2, hidden, hidden)
    b2 = _linear_bias(kb2, hidden, hidden)

    # Pad params once (hoisted out of the per-step path, as in a real agent loop).
    w1p, b1p, w2p, b2p = prepare_params(w1, b1, w2, b2)

    # --- small batch (typical per-step inference) ---
    batch = 8
    x = jax.random.normal(kx, (batch, in_features), jnp.float32)
    y_padded = jax.block_until_ready(ffactor_forward_padded(x, w1p, b1p, w2p, b2p))
    y = y_padded[:batch, :hidden]
    y_ref = _reference_forward(x, w1, b1, w2, b2)
    assert y.shape == (batch, hidden)
    assert jnp.max(jnp.abs(y - y_ref)) < 1e-4

    # --- ragged larger batch (exercises batch tiling + pad path) ---
    batch2 = 200
    x2 = jax.random.normal(kx2, (batch2, in_features), jnp.float32)
    y2_padded = jax.block_until_ready(ffactor_forward_padded(x2, w1p, b1p, w2p, b2p))
    y2 = y2_padded[:batch2, :hidden]
    y2_ref = _reference_forward(x2, w1, b1, w2, b2)
    assert jnp.max(jnp.abs(y2 - y2_ref)) < 1e-4

    print("KERNEL_OK")
</pallas_src>

<mosaic_0001>
module attributes {stable_mosaic.version = 11 : i64} {
  func.func @_ffactor_kernel(%arg0: i32, %arg1: memref<8x8xf32, #tpu.memory_space<vmem>>, %arg2: memref<8x128xf32, #tpu.memory_space<vmem>>, %arg3: memref<1x128xf32, #tpu.memory_space<vmem>>, %arg4: memref<128x128xf32, #tpu.memory_space<vmem>>, %arg5: memref<1x128xf32, #tpu.memory_space<vmem>>, %arg6: memref<8x128xf32, #tpu.memory_space<vmem>>) attributes {dimension_semantics = [#tpu.dimension_semantics<parallel>], iteration_bounds = array<i64: 1>, scalar_prefetch = 0 : i64, scratch_operands = 0 : i64, tpu.core_type = #tpu.core_type<tc>, window_params = [{transform_indices = @transform_0, window_bounds = array<i64: 8, 8>}, {pipeline_mode = #tpu.pipeline_mode<synchronous>, transform_indices = @transform_1, window_bounds = array<i64: 8, 128>}, {pipeline_mode = #tpu.pipeline_mode<synchronous>, transform_indices = @transform_2, window_bounds = array<i64: 1, 128>}, {pipeline_mode = #tpu.pipeline_mode<synchronous>, transform_indices = @transform_3, window_bounds = array<i64: 128, 128>}, {pipeline_mode = #tpu.pipeline_mode<synchronous>, transform_indices = @transform_4, window_bounds = array<i64: 1, 128>}, {transform_indices = @transform_5, window_bounds = array<i64: 8, 128>}]} {
    %c0 = arith.constant 0 : index
    %c0_0 = arith.constant 0 : index
    %0 = vector.load %arg1[%c0, %c0_0] : memref<8x8xf32, #tpu.memory_space<vmem>>, vector<8x8xf32>
    %c0_1 = arith.constant 0 : index
    %c0_2 = arith.constant 0 : index
    %1 = vector.load %arg2[%c0_1, %c0_2] : memref<8x128xf32, #tpu.memory_space<vmem>>, vector<8x128xf32>
    %cst = arith.constant dense<0.000000e+00> : vector<8x128xf32>
    %2 = tpu.matmul %0, %1, %cst {dimension_numbers = #tpu.dot_dimension_numbers<[1], [0], [0], [1], [0, 0, 1, 1], [], []>} : vector<8x8xf32>, vector<8x128xf32>, vector<8x128xf32> -> vector<8x128xf32>
    %c0_3 = arith.constant 0 : index
    %c0_4 = arith.constant 0 : index
    %3 = vector.load %arg3[%c0_3, %c0_4] : memref<1x128xf32, #tpu.memory_space<vmem>>, vector<1x128xf32>
    %4 = vector.broadcast %3 : vector<1x128xf32> to vector<8x128xf32>
    %5 = arith.addf %2, %4 : vector<8x128xf32>
    %cst_5 = arith.constant 0.000000e+00 : f32
    %6 = vector.broadcast %cst_5 : f32 to vector<8x128xf32>
    %7 = arith.maximumf %5, %6 : vector<8x128xf32>
    %8 = arith.mulf %7, %7 : vector<8x128xf32>
    %cst_6 = arith.constant dense<0.000000e+00> : vector<8xf32>
    %9 = vector.multi_reduction <add>, %8, %cst_6 [1] : vector<8x128xf32> to vector<8xf32>
    %10 = vector.shape_cast %9 : vector<8xf32> to vector<8x1xf32>
    %cst_7 = arith.constant 1.000000e-24 : f32
    %11 = vector.broadcast %cst_7 : f32 to vector<8x1xf32>
    %12 = arith.maximumf %10, %11 : vector<8x1xf32>
    %13 = math.rsqrt %12 : vector<8x1xf32>
    %14 = vector.broadcast %13 : vector<8x1xf32> to vector<8x128xf32>
    %15 = arith.mulf %7, %14 : vector<8x128xf32>
    %c0_8 = arith.constant 0 : index
    %c0_9 = arith.constant 0 : index
    %16 = vector.load %arg4[%c0_8, %c0_9] : memref<128x128xf32, #tpu.memory_space<vmem>>, vector<128x128xf32>
    %cst_10 = arith.constant dense<0.000000e+00> : vector<8x128xf32>
    %17 = tpu.matmul %15, %16, %cst_10 {dimension_numbers = #tpu.dot_dimension_numbers<[1], [0], [0], [1], [0, 0, 1, 1], [], []>} : vector<8x128xf32>, vector<128x128xf32>, vector<8x128xf32> -> vector<8x128xf32>
    %c0_11 = arith.constant 0 : index
    %c0_12 = arith.constant 0 : index
    %18 = vector.load %arg5[%c0_11, %c0_12] : memref<1x128xf32, #tpu.memory_space<vmem>>, vector<1x128xf32>
    %19 = vector.broadcast %18 : vector<1x128xf32> to vector<8x128xf32>
    %20 = arith.addf %17, %19 : vector<8x128xf32>
    %cst_13 = arith.constant 0.000000e+00 : f32
    %21 = vector.broadcast %cst_13 : f32 to vector<8x128xf32>
    %22 = arith.maximumf %20, %21 : vector<8x128xf32>
    %c0_14 = arith.constant 0 : index
    %c0_15 = arith.constant 0 : index
    %23 = vector.load %arg6[%c0_14, %c0_15] : memref<8x128xf32, #tpu.memory_space<vmem>>, vector<8x128xf32>
    tpu.vector_store %arg6[%c0_14, %c0_15], %22 {strides = array<i32>} : memref<8x128xf32, #tpu.memory_space<vmem>>, vector<8x128xf32>,
    return
  }
  func.func @transform_0(%arg0: i32) -> (i32, i32) {
    %c0_i32 = arith.constant 0 : i32
    %c0_i32_0 = arith.constant 0 : i32
    return %arg0, %c0_i32 : i32, i32
  }
  func.func @transform_1(%arg0: i32) -> (i32, i32) {
    %c0_i32 = arith.constant 0 : i32
    %c0_i32_0 = arith.constant 0 : i32
    %c0_i32_1 = arith.constant 0 : i32
    return %c0_i32, %c0_i32_0 : i32, i32
  }
  func.func @transform_2(%arg0: i32) -> (i32, i32) {
    %c0_i32 = arith.constant 0 : i32
    %c0_i32_0 = arith.constant 0 : i32
    %c0_i32_1 = arith.constant 0 : i32
    return %c0_i32, %c0_i32_0 : i32, i32
  }
  func.func @transform_3(%arg0: i32) -> (i32, i32) {
    %c0_i32 = arith.constant 0 : i32
    %c0_i32_0 = arith.constant 0 : i32
    %c0_i32_1 = arith.constant 0 : i32
    return %c0_i32, %c0_i32_0 : i32, i32
  }
  func.func @transform_4(%arg0: i32) -> (i32, i32) {
    %c0_i32 = arith.constant 0 : i32
    %c0_i32_0 = arith.constant 0 : i32
    %c0_i32_1 = arith.constant 0 : i32
    return %c0_i32, %c0_i32_0 : i32, i32
  }
  func.func @transform_5(%arg0: i32) -> (i32, i32) {
    %c0_i32 = arith.constant 0 : i32
    %c0_i32_0 = arith.constant 0 : i32
    return %arg0, %c0_i32 : i32, i32
  }
}

</mosaic_0001>

<bundles_post_ra>
// kernel: ffactor_forward_padded.1
= control target key start
LH: loop header
LB: loop body
LE: loop exit
PB: predicated region body
PF: predicated region fallthrough
CT: control target
= control target key end

     0   :  { %10 = vsyncpa [#allocation3], 0  ;;  %s403_s0 = inlined_call_operand.vmem [shape: f32[8,8], index: 0, kind: input, shape index: {}]   ;;  %s404_s1 = inlined_call_operand.vmem [shape: f32[8,128], index: 1, kind: input, shape index: {}]   ;;  %s405_s2 = inlined_call_operand.vmem [shape: f32[1,128], index: 2, kind: input, shape index: {}]   ;;  %s406_s3 = inlined_call_operand.hbm [shape: f32[128,128], index: 3, kind: input, shape index: {}]   ;;  %s407_s4 = inlined_call_operand.vmem [shape: f32[1,128], index: 4, kind: input, shape index: {}]   ;;  %s408_s5 = inlined_call_operand.hbm [shape: f32[8,128], index: 5, kind: output, shape index: {}]  }
   0x1   :  { %11 = vsyncpa [#allocation4], 0  ;;  %s349_s18 = smov [#allocation2]  }
   0x2   :  { %s23_s19 = sshll.u32 %s349_s18, 4  ;;  %s24_s19 = int_to_ptr.vmem [resolvable:$true] %s23_s19 }
   0x3   :  { %s313_s20 = scalar_lea.vmem %s24_s19, 2048  ;;  %p318_p1 = scmp.lt.s32.totalorder %s24_s19, %s24_s19 }
   0x4   :  { %p314_p0 = scmp.ne.s32.totalorder %s24_s19, %s313_s20  ;;  %p319_p2 = scmp.lt.s32.totalorder %s313_s20, %s313_s20 }
   0x6   :  { %p320_p3 = por %p319_p2, %p318_p1 }
   0x8   :  { %p321_p4 = pnand %p320_p3, %p314_p0 }
   0xa   :  { %324 = shalt.err (!%p321_p4)
}
   0xb   :  { %s350_s21 = smov 128   ;;  %s351_s22 = smov 8  }
   0xc   :  { %29 = dma.hbm_to_vmem [thread:$0]  %s406_s3, 2048, %s24_s19, [#allocation3], %s350_s21, %s350_s21, %s351_s22  }
   0xd   :  { %345 = dma.done.wait [#allocation3], 2048  }
   0xe   :  { %346 = vsyncadd [#allocation3], 4294965248  ;;  %v352_v0 = vmov 0.0   ;;  %vm353_vm0 = vmmov 0   ;;  %vm44_vm1 = vcmask 64512   ;;  %v36_v1 = vld [vmem:[%s404_s1] sm:$0xff] }
   0xf   :  { %257 = vmatprep.subr.mxu0 %v352_v0  ;;  %259 = vmatprep.mubr.msk.f32.mxu0 %vm353_vm0, %v352_v0  ;;  %v35_v2 = vld [vmem:[%s403_s0] sm:$0xff]  ;;  %v140_v3 = vld [vmem:[#allocation2 + $0x78] sm:$0xff]  ;;  %v139_v4 = vld [vmem:[#allocation2 + $0x70] sm:$0xff]  ;;  %s354_s29 = smov [#allocation5]  }
  0x10   :  { %262 = vmatprep.subr.mxu1 %v352_v0  ;;  %294 = vmatprep.mubr.msk.f32.mxu1 %vm353_vm0, %v352_v0  ;;  %v138_v5 = vld [vmem:[#allocation2 + $0x68] sm:$0xff]  ;;  %v137_v6 = vld [vmem:[#allocation2 + $0x60] sm:$0xff]  ;;  %v136_v7 = vld [vmem:[#allocation2 + $0x58] sm:$0xff]  ;;  %s226_s30 = sshll.u32 %s354_s29, 4  ;;  %s227_s30 = int_to_ptr.vmem [resolvable:$true] %s226_s30 }
  0x11   :  { %258 = vmatpush3.msra.mxu0 %v36_v1  ;;  %263 = vmatpush3.msra.mxu1 %v140_v3  ;;  %v135_v8 = vld [vmem:[#allocation2 + $0x50] sm:$0xff]  ;;  %v235_v9 = vld [vmem:[%s405_s2] ss:$0 sm:$0xff]  ;;  %v134_v15 = vld [vmem:[#allocation2 + $0x48] sm:$0xff]  ;;  %s325_s6 = scalar_lea.vmem %s227_s30, 128  ;;  %p330_p6 = scmp.lt.s32.totalorder %s227_s30, %s227_s30 }
  0x12   :  { %260 = vmatmul.mubr.msk.f32.vlgmr.msra.gmra.mxu0 %vm44_vm1, %v35_v2  ;;  %264 = vmatprep.subr.mxu1 %v352_v0  ;;  %v133_v16 = vld [vmem:[#allocation2 + $0x40] sm:$0xff]  ;;  %v132_v17 = vld [vmem:[#allocation2 + $0x38] sm:$0xff]  ;;  %v131_v18 = vld [vmem:[#allocation2 + $0x30] sm:$0xff]  ;;  %p326_p5 = scmp.ne.s32.totalorder %s227_s30, %s325_s6  ;;  %p331_p7 = scmp.lt.s32.totalorder %s325_s6, %s325_s6 }
  0x13   :  { %265 = vmatpush3.msra.mxu1 %v139_v4  ;;  %v130_v19 = vld [vmem:[#allocation2 + $0x28] sm:$0xff]  ;;  %v129_v20 = vld [vmem:[#allocation2 + $0x20] sm:$0xff]  ;;  %v128_v21 = vld [vmem:[#allocation2 + $0x18] sm:$0xff] }
  0x14   :  { %266 = vmatprep.subr.mxu1 %v352_v0  ;;  %v127_v22 = vld [vmem:[#allocation2 + $0x10] sm:$0xff]  ;;  %v126_v23 = vld [vmem:[#allocation2 + $0x8] sm:$0xff]  ;;  %v125_v24 = vld [vmem:[#allocation2] sm:$0xff]  ;;  %p332_p8 = por %p331_p7, %p330_p6 }
  0x15   :  { %267 = vmatpush3.msra.mxu1 %v138_v5  ;;  %v237_v29 = vld [vmem:[%s407_s4] ss:$0 sm:$0xff] }
  0x16   :  { %268 = vmatprep.subr.mxu1 %v352_v0  ;;  %p333_p9 = pnand %p332_p8, %p326_p5 }
  0x17   :  { %269 = vmatpush3.msra.mxu1 %v137_v6 }
  0x18   :  { %270 = vmatprep.subr.mxu1 %v352_v0 }
  0x19   :  { %271 = vmatpush3.msra.mxu1 %v136_v7 }
  0x1a   :  { %272 = vmatprep.subr.mxu1 %v352_v0 }
  0x1b   :  { %273 = vmatpush3.msra.mxu1 %v135_v8 }
  0x1c   :  { %274 = vmatprep.subr.mxu1 %v352_v0 }
  0x1d   :  { %275 = vmatpush3.msra.mxu1 %v134_v15 }
  0x1e   :  { %276 = vmatprep.subr.mxu1 %v352_v0 }
  0x1f   :  { %277 = vmatpush3.msra.mxu1 %v133_v16 }
  0x20   :  { %278 = vmatprep.subr.mxu1 %v352_v0 }
  0x21   :  { %279 = vmatpush3.msra.mxu1 %v132_v17 }
  0x22   :  { %280 = vmatprep.subr.mxu1 %v352_v0 }
  0x23   :  { %281 = vmatpush3.msra.mxu1 %v131_v18 }
  0x24   :  { %282 = vmatprep.subr.mxu1 %v352_v0 }
  0x25   :  { %283 = vmatpush3.msra.mxu1 %v130_v19 }
  0x26   :  { %284 = vmatprep.subr.mxu1 %v352_v0 }
  0x27   :  { %285 = vmatpush3.msra.mxu1 %v129_v20 }
  0x28   :  { %286 = vmatprep.subr.mxu1 %v352_v0 }
  0x29   :  { %287 = vmatpush3.msra.mxu1 %v128_v21 }
  0x2a   :  { %288 = vmatprep.subr.mxu1 %v352_v0 }
  0x2b   :  { %289 = vmatpush3.msra.mxu1 %v127_v22 }
  0x2c   :  { %290 = vmatprep.subr.mxu1 %v352_v0 }
  0x2d   :  { %291 = vmatpush3.msra.mxu1 %v126_v23 }
  0x2e   :  { %292 = vmatprep.subr.mxu1 %v352_v0 }
  0x2f   :  { %293 = vmatpush3.msra.mxu1 %v125_v24 }
  0xd2   :  { %v114_v10 = vpop.f32.mrf.mxu0 }
  0xd3   :  { %v115_v11 = vadd.f32 %v235_v9, %v114_v10 }
  0xd4   :  { %v261_v12 = vpop.f32.mrf.mxu0 }
  0xd5   :  { %v118_v13 = vmax.f32 %v115_v11, 0.0 }
  0xd7   :  { %v119_v14 = vmul.f32 %v118_v13, %v118_v13 }
  0xd9   :  { %120 = vadd.xlane.f32.xlu0 %v119_v14 }
 0x162   :  { %v121_v25 = vpop.xlane.xlu0 %120 }
 0x163   :  { %v122_v26 = vmax.f32 %v121_v25, 1e-24 }
 0x165   :  { %303 = vrsqrt.f32 %v122_v26 }
 0x172   :  { %v304_v27 = vpop.eup %303 }
 0x173   :  { %v124_v28 = vmul.f32 %v304_v27, %v118_v13 }
 0x175   :  { %295 = vmatmul.mubr.f32.vlgmr.msra.gmra.mxu1 %v124_v28 }
 0x235   :  { %v214_v30 = vpop.f32.mrf.mxu1 }
 0x236   :  { %v215_v31 = vadd.f32 %v237_v29, %v214_v30 }
 0x237   :  { %v296_v32 = vpop.f32.mrf.mxu1 }
 0x238   :  { %v218_v33 = vmax.f32 %v215_v31, 0.0 }
 0x23a   :  { %219 = vst [vmem:[#allocation5] sm:$0xff] %v218_v33 }
 0x23b   :  { %336 = shalt.err (!%p333_p9)
}
 0x23c   :  { %229 = dma.vmem_to_hbm [thread:$0]  %s227_s30, 128, %s408_s5, [#allocation4]  }
 0x23d   :  { %347 = dma.done.wait [#allocation4], 128  }
 0x23e   :  { %348 = vsyncadd [#allocation4], 4294967168 }
 0x23f   :  { %233 = vsyncpa [#allocation3], 1 }
 0x240   :  { %234 = vsyncpa [#allocation4], 1 }

</bundles_post_ra>
